<compile_context>
chip_gen: v7x
topology: tpu7x:2x2x1
jax: 0.10.0
libtpu: 0.0.40
codegen_flags: <defaults>
</compile_context>

<pallas_src>
import numpy as np
import jax
import jax.numpy as jnp
from jax import lax
from jax.experimental import pallas as pl
from jax.experimental.pallas import tpu as pltpu

# 8 neighbor offsets (dy, dx), matching the order of the torch gradient_kernel.
_OFFSETS = ((-1, -1), (-1, 0), (-1, 1), (0, -1), (0, 1), (1, -1), (1, 0), (1, 1))


# ---------------------------------------------------------------------------
# Host-side constant builders (hoisted out of the kernel, passed as inputs)
# ---------------------------------------------------------------------------
def _boundary_count_np(h, w):
    # cnt[y, x] = number of the 8 neighbor offsets that fall outside the image
    #           = 3*[row boundary] + 3*[col boundary] - [corner]
    cnt = np.zeros((h, w), np.float32)
    cnt[0, :] += 3.0
    cnt[-1, :] += 3.0
    cnt[:, 0] += 3.0
    cnt[:, -1] += 3.0
    cnt[0, 0] -= 1.0
    cnt[0, -1] -= 1.0
    cnt[-1, 0] -= 1.0
    cnt[-1, -1] -= 1.0
    return cnt


def _pool_rows_np(h, n):
    # A[i, u] = 1 iff u // n == i   (shape (h//n, h)): sums rows in blocks of n
    a = np.zeros((h // n, h), np.float32)
    for i in range(h // n):
        a[i, i * n:(i + 1) * n] = 1.0
    return a


def _pool_cols_np(w, n):
    # B[v, j] = 1 iff v // n == j   (shape (w, w//n)): sums cols in blocks of n
    return np.ascontiguousarray(_pool_rows_np(w, n).T)


# ---------------------------------------------------------------------------
# Pallas kernel: per-block partial absolute-error sums (TB images per step)
# ---------------------------------------------------------------------------
def _gloss_kernel(i_ref, ihat_ref, cnt1_ref, cnt2_ref, cnt4_ref,
                  p2r_ref, p2c_ref, p4r_ref, p4c_ref, out_ref):
    TB = i_ref.shape[0]

    # Hoisted constants: DMA'd once (constant index_map), loaded once per step.
    cnt1 = cnt1_ref[...]
    cnt2 = cnt2_ref[...]
    cnt4 = cnt4_ref[...]
    p2r = p2r_ref[...]
    p2c = p2c_ref[...]
    p4r = p4r_ref[...]
    p4c = p4c_ref[...]

    def grad_abs_sum(e, cnt):
        """Sum over the 8 (+center, -neighbor) directions of
           sum_{y,x} | e[y,x] - zero_padded_shift(e)[y,x] |."""
        sv = jnp.sum(jnp.abs(e[1:, :] - e[:-1, :]))        # vertical diffs
        sh = jnp.sum(jnp.abs(e[:, 1:] - e[:, :-1]))        # horizontal diffs
        sd = jnp.sum(jnp.abs(e[1:, 1:] - e[:-1, :-1])      # main diagonal
                     + jnp.abs(e[1:, :-1] - e[:-1, 1:]))   # anti diagonal
        edge = jnp.sum(cnt * jnp.abs(e))                   # zero-padding boundary
        return 2.0 * (sv + sh + sd) + edge

    def block_sum(e, pr, pc):
        # n x n box-sum downsample as two tiny matmuls (MXU is otherwise idle).
        t = jnp.dot(pr, e, preferred_element_type=jnp.float32)
        return jnp.dot(t, pc, preferred_element_type=jnp.float32)

    def body(t, carry):
        px, g0, g2, g4 = carry
        d = i_ref[t].astype(jnp.float32) - ihat_ref[t].astype(jnp.float32)  # (C,H,W)
        px = px + jnp.sum(jnp.abs(d))
        e = jnp.sum(d, axis=0)                    # (H, W) channel-summed diff
        g0 = g0 + grad_abs_sum(e, cnt1)           # full resolution
        e2 = block_sum(e, p2r, p2c)               # n=2 box-sum downsample
        g2 = g2 + grad_abs_sum(e2, cnt2)
        e4 = block_sum(e2, p4r, p4c)              # n=4 (2x2 of the n=2 result)
        g4 = g4 + grad_abs_sum(e4, cnt4)
        return px, g0, g2, g4

    # fori_loop (not a Python unroll): bounds the live working set to one image.
    zero = jnp.float32(0.0)
    px, g0, g2, g4 = lax.fori_loop(0, TB, body, (zero, zero, zero, zero))

    lane = lax.broadcasted_iota(jnp.int32, (1, 8, 128), 2)
    sub = lax.broadcasted_iota(jnp.int32, (1, 8, 128), 1)

    def sel(k, v):
        return jnp.where(jnp.logical_and(sub == 0, lane == k), v, 0.0)

    out_ref[...] = (sel(0, px) + sel(1, g0) + sel(2, g2) + sel(3, g4)).astype(jnp.float32)


# ---------------------------------------------------------------------------
# Wrapper: generation-aware block sizing, batch padding, final weighting
# ---------------------------------------------------------------------------
def _vmem_capacity_bytes():
    try:
        return int(pltpu.get_tpu_info().vmem_capacity_bytes)
    except Exception:
        return 64 << 20   # conservative fallback (v7x-class VMEM)


def gloss_pallas(I, I_hat):
    B, C, H, W = I.shape
    if I_hat.shape != I.shape:
        raise ValueError("I and I_hat must have identical shapes")
    if not (H % 4 == 0 and W % 4 == 0 and H >= 8 and W >= 8):
        raise ValueError("H, W must be multiples of 4 and >= 8 for the n in {2,4} split losses")

    # ---- generation-aware block sizing -------------------------------------
    vmem_cap = _vmem_capacity_bytes()                       # physical VMEM / TC
    vmem_limit = min(int(vmem_cap * 0.75), 96 << 20)        # ~48 MiB v7x, ~96 MiB v5e/v6e

    img_in_bytes = C * H * W * I.dtype.itemsize
    img_f32_bytes = C * H * W * 4
    const_elems = (H * W + (H // 2) * (W // 2) + (H // 4) * (W // 4)
                   + (H // 2) * H + W * (W // 2)
                   + (H // 4) * (H // 2) + (W // 2) * (W // 4))
    # In-kernel f32 working set (one image at a time thanks to fori_loop) +
    # double-buffered constant inputs + output + slack.
    temp_bytes = 2 * img_f32_bytes + 4 * H * W * 4 + 2 * const_elems * 4 + (2 << 20)

    # Per-input block target: ~16 MiB on 128-MiB-VMEM parts, ~6 MiB on v7x.
    block_target = (6 << 20) if vmem_cap <= (64 << 20) else (16 << 20)
    # What actually fits: 2 inputs x 2 pipeline buffers x block + temps <= limit.
    fit_cap = max((vmem_limit - temp_bytes) // 4, 0)
    if img_in_bytes > fit_cap:
        # TODO(synk): H-tiled grid axis with a 1-row halo for very large images.
        raise NotImplementedError(
            f"single image ({img_in_bytes / 2**20:.1f} MiB) exceeds the per-block "
            f"VMEM budget ({fit_cap / 2**20:.1f} MiB); H-tiled path not implemented")
    block_cap = max(min(block_target, fit_cap), img_in_bytes)

    TB = max(1, min(B, block_cap // img_in_bytes))
    num_blocks = pl.cdiv(B, TB)
    if num_blocks < 2 and B > 1:
        # Keep >= 2 grid blocks so the "parallel" axis can shard across v7x's
        # two TensorCores (effectively a no-op on single-TC v5e/v6e).
        TB = pl.cdiv(B, 2)
        num_blocks = pl.cdiv(B, TB)

    # ---- zero-pad the batch so B is a multiple of TB ------------------------
    # Padded images are zero in both inputs -> diff == 0 -> contribute nothing.
    B_pad = num_blocks * TB
    Ip, Ihp = I, I_hat
    if B_pad != B:
        Ip = jnp.concatenate([I, jnp.zeros((B_pad - B, C, H, W), I.dtype)], axis=0)
        Ihp = jnp.concatenate([I_hat, jnp.zeros((B_pad - B, C, H, W), I_hat.dtype)], axis=0)

    # ---- hoisted constants (DMA'd once; constant index_map) -----------------
    cnt1 = jnp.asarray(_boundary_count_np(H, W))
    cnt2 = jnp.asarray(_boundary_count_np(H // 2, W // 2))
    cnt4 = jnp.asarray(_boundary_count_np(H // 4, W // 4))
    p2r = jnp.asarray(_pool_rows_np(H, 2))
    p2c = jnp.asarray(_pool_cols_np(W, 2))
    p4r = jnp.asarray(_pool_rows_np(H // 2, 2))
    p4c = jnp.asarray(_pool_cols_np(W // 2, 2))

    def const_spec(a):
        return pl.BlockSpec(a.shape, lambda b: (0,) * a.ndim)

    sums = pl.pallas_call(
        _gloss_kernel,
        out_shape=jax.ShapeDtypeStruct((num_blocks, 8, 128), jnp.float32),
        grid_spec=pltpu.PrefetchScalarGridSpec(
            num_scalar_prefetch=0,
            grid=(num_blocks,),
            in_specs=[
                pl.BlockSpec((TB, C, H, W), lambda b: (b, 0, 0, 0)),
                pl.BlockSpec((TB, C, H, W), lambda b: (b, 0, 0, 0)),
                const_spec(cnt1), const_spec(cnt2), const_spec(cnt4),
                const_spec(p2r), const_spec(p2c),
                const_spec(p4r), const_spec(p4c),
            ],
            out_specs=pl.BlockSpec((1, 8, 128), lambda b: (b, 0, 0)),
        ),
        compiler_params=pltpu.CompilerParams(
            dimension_semantics=("parallel",),     # per-block partials -> megacore OK
            vmem_limit_bytes=int(vmem_limit)),
    )(Ip, Ihp, cnt1, cnt2, cnt4, p2r, p2c, p4r, p4c)

    partial = jnp.sum(sums, axis=(0, 1))  # (128,); only lanes 0..3 are nonzero
    pixel_sum = partial[0]
    grad_sum = partial[1]
    grad2_sum = partial[2]
    grad4_sum = partial[3]

    # Normalizers use the ORIGINAL batch size (padded images contributed 0).
    pixel_loss = pixel_sum / (B * C * H * W)
    gradient_loss = grad_sum / (B * 8 * H * W)
    split2_loss = grad2_sum / (B * 8 * (H // 2) * (W // 2))
    split4_loss = grad4_sum / (B * 8 * (H // 4) * (W // 4))

    # splitting_coeffs = [1/4, 1/16, 0]; avg/max pool coeffs are all zero.
    return pixel_loss + gradient_loss + 0.25 * split2_loss + (1.0 / 16.0) * split4_loss


# ---------------------------------------------------------------------------
# Pure-JAX reference (mirrors the PyTorch module literally, for validation)
# ---------------------------------------------------------------------------
def _make_grad_kernel():
    k = np.zeros((8, 1, 3, 3), dtype=np.float32)
    for idx, (dy, dx) in enumerate(_OFFSETS):
        k[idx, 0, 1, 1] = 1.0
        k[idx, 0, 1 + dy, 1 + dx] = -1.0
    return jnp.asarray(k)


def gloss_reference(I, I_hat):
    grad_k = _make_grad_kernel()

    def p_loss(a, b):
        return jnp.mean(jnp.abs(a - b))

    def conv_grad(x):
        c = x.shape[1]
        w = jnp.broadcast_to(grad_k, (8, c, 3, 3))
        return lax.conv_general_dilated(
            x, w, window_strides=(1, 1), padding=((1, 1), (1, 1)),
            dimension_numbers=("NCHW", "OIHW", "NCHW"),
            precision=lax.Precision.HIGHEST)

    def gradient_loss(a, b):
        return p_loss(conv_grad(a), conv_grad(b))

    def splitting(x, n):
        b, c, h, w = x.shape
        xs = x.reshape(b, c, h // n, n, w // n, n)
        xs = jnp.transpose(xs, (0, 1, 3, 5, 2, 4))
        return xs.reshape(b, c * n * n, h // n, w // n)

    loss = p_loss(I, I_hat) + gradient_loss(I, I_hat)
    loss = loss + 0.25 * gradient_loss(splitting(I, 2), splitting(I_hat, 2))
    loss = loss + (1.0 / 16.0) * gradient_loss(splitting(I, 4), splitting(I_hat, 4))
    return loss


if __name__ == "__main__":
    key = jax.random.PRNGKey(0)
    k1, k2, k3, k4 = jax.random.split(key, 4)

    # Primary small case (matches the module's implied NCHW image input).
    B, C, H, W = 2, 4, 16, 16
    I = jax.random.normal(k1, (B, C, H, W), dtype=jnp.float32)
    I_hat = jax.random.normal(k2, (B, C, H, W), dtype=jnp.float32)
    out = jax.block_until_ready(gloss_pallas(I, I_hat))
    ref = jax.block_until_ready(gloss_reference(I, I_hat))
    np.testing.assert_allclose(np.asarray(out), np.asarray(ref), rtol=2e-4, atol=1e-5)

    # Exercises the ragged-batch zero-padding path (B=3 is not a multiple of TB)
    # and a non-square spatial size.
    B2, C2, H2, W2 = 3, 3, 24, 32
    I2 = jax.random.normal(k3, (B2, C2, H2, W2), dtype=jnp.float32)
    I2_hat = jax.random.normal(k4, (B2, C2, H2, W2), dtype=jnp.float32)
    out2 = jax.block_until_ready(gloss_pallas(I2, I2_hat))
    ref2 = jax.block_until_ready(gloss_reference(I2, I2_hat))
    np.testing.assert_allclose(np.asarray(out2), np.asarray(ref2), rtol=2e-4, atol=1e-5)

    print("KERNEL_OK")
</pallas_src>

<mosaic_0001>
module attributes {stable_mosaic.version = 11 : i64} {
  func.func @_gloss_kernel(%arg0: i32, %arg1: memref<1x4x16x16xf32, #tpu.memory_space<vmem>>, %arg2: memref<1x4x16x16xf32, #tpu.memory_space<vmem>>, %arg3: memref<16x16xf32, #tpu.memory_space<vmem>>, %arg4: memref<8x8xf32, #tpu.memory_space<vmem>>, %arg5: memref<4x4xf32, #tpu.memory_space<vmem>>, %arg6: memref<8x16xf32, #tpu.memory_space<vmem>>, %arg7: memref<16x8xf32, #tpu.memory_space<vmem>>, %arg8: memref<4x8xf32, #tpu.memory_space<vmem>>, %arg9: memref<8x4xf32, #tpu.memory_space<vmem>>, %arg10: memref<1x8x128xf32, #tpu.memory_space<vmem>>) attributes {dimension_semantics = [#tpu.dimension_semantics<parallel>], iteration_bounds = array<i64: 2>, scalar_prefetch = 0 : i64, scratch_operands = 0 : i64, tpu.core_type = #tpu.core_type<tc>, window_params = [{transform_indices = @transform_0, window_bounds = array<i64: 1, 4, 16, 16>}, {transform_indices = @transform_1, window_bounds = array<i64: 1, 4, 16, 16>}, {pipeline_mode = #tpu.pipeline_mode<synchronous>, transform_indices = @transform_2, window_bounds = array<i64: 16, 16>}, {pipeline_mode = #tpu.pipeline_mode<synchronous>, transform_indices = @transform_3, window_bounds = array<i64: 8, 8>}, {pipeline_mode = #tpu.pipeline_mode<synchronous>, transform_indices = @transform_4, window_bounds = array<i64: 4, 4>}, {pipeline_mode = #tpu.pipeline_mode<synchronous>, transform_indices = @transform_5, window_bounds = array<i64: 8, 16>}, {pipeline_mode = #tpu.pipeline_mode<synchronous>, transform_indices = @transform_6, window_bounds = array<i64: 16, 8>}, {pipeline_mode = #tpu.pipeline_mode<synchronous>, transform_indices = @transform_7, window_bounds = array<i64: 4, 8>}, {pipeline_mode = #tpu.pipeline_mode<synchronous>, transform_indices = @transform_8, window_bounds = array<i64: 8, 4>}, {transform_indices = @transform_9, window_bounds = array<i64: 1, 8, 128>}]} {
    %c0 = arith.constant 0 : index
    %c0_0 = arith.constant 0 : index
    %0 = vector.load %arg3[%c0, %c0_0] : memref<16x16xf32, #tpu.memory_space<vmem>>, vector<16x16xf32>
    %c0_1 = arith.constant 0 : index
    %c0_2 = arith.constant 0 : index
    %1 = vector.load %arg4[%c0_1, %c0_2] : memref<8x8xf32, #tpu.memory_space<vmem>>, vector<8x8xf32>
    %c0_3 = arith.constant 0 : index
    %c0_4 = arith.constant 0 : index
    %2 = vector.load %arg5[%c0_3, %c0_4] : memref<4x4xf32, #tpu.memory_space<vmem>>, vector<4x4xf32>
    %c0_5 = arith.constant 0 : index
    %c0_6 = arith.constant 0 : index
    %3 = vector.load %arg6[%c0_5, %c0_6] : memref<8x16xf32, #tpu.memory_space<vmem>>, vector<8x16xf32>
    %c0_7 = arith.constant 0 : index
    %c0_8 = arith.constant 0 : index
    %4 = vector.load %arg7[%c0_7, %c0_8] : memref<16x8xf32, #tpu.memory_space<vmem>>, vector<16x8xf32>
    %c0_9 = arith.constant 0 : index
    %c0_10 = arith.constant 0 : index
    %5 = vector.load %arg8[%c0_9, %c0_10] : memref<4x8xf32, #tpu.memory_space<vmem>>, vector<4x8xf32>
    %c0_11 = arith.constant 0 : index
    %c0_12 = arith.constant 0 : index
    %6 = vector.load %arg9[%c0_11, %c0_12] : memref<8x4xf32, #tpu.memory_space<vmem>>, vector<8x4xf32>
    %cst = arith.constant 0.000000e+00 : f32
    %cst_13 = arith.constant 0.000000e+00 : f32
    %cst_14 = arith.constant 0.000000e+00 : f32
    %cst_15 = arith.constant 0.000000e+00 : f32
    %c0_i32 = arith.constant 0 : i32
    %7 = arith.index_cast %c0_i32 : i32 to index
    %c0_16 = arith.constant 0 : index
    %c0_17 = arith.constant 0 : index
    %c0_18 = arith.constant 0 : index
    %8 = vector.load %arg1[%7, %c0_16, %c0_17, %c0_18] : memref<1x4x16x16xf32, #tpu.memory_space<vmem>>, vector<1x4x16x16xf32>
    %9 = vector.shape_cast %8 : vector<1x4x16x16xf32> to vector<4x16x16xf32>
    %10 = arith.index_cast %c0_i32 : i32 to index
    %c0_19 = arith.constant 0 : index
    %c0_20 = arith.constant 0 : index
    %c0_21 = arith.constant 0 : index
    %11 = vector.load %arg2[%10, %c0_19, %c0_20, %c0_21] : memref<1x4x16x16xf32, #tpu.memory_space<vmem>>, vector<1x4x16x16xf32>
    %12 = vector.shape_cast %11 : vector<1x4x16x16xf32> to vector<4x16x16xf32>
    %13 = arith.subf %9, %12 : vector<4x16x16xf32>
    %14 = math.absf %13 : vector<4x16x16xf32>
    %15 = vector.shape_cast %14 : vector<4x16x16xf32> to vector<1x4x16x16xf32>
    %cst_22 = arith.constant dense<0.000000e+00> : vector<1xf32>
    %16 = vector.multi_reduction <add>, %15, %cst_22 [1, 2, 3] : vector<1x4x16x16xf32> to vector<1xf32>
    %17 = vector.shape_cast %16 : vector<1xf32> to vector<1x1x1x1xf32>
    %18 = vector.extract %17[0, 0, 0, 0] : f32 from vector<1x1x1x1xf32>
    %19 = arith.addf %cst, %18 : f32
    %cst_23 = arith.constant dense<0.000000e+00> : vector<16x16xf32>
    %20 = vector.multi_reduction <add>, %13, %cst_23 [0] : vector<4x16x16xf32> to vector<16x16xf32>
    %21 = vector.extract_strided_slice %20 {offsets = [1, 0], sizes = [15, 16], strides = [1, 1]} : vector<16x16xf32> to vector<15x16xf32>
    %22 = vector.extract_strided_slice %20 {offsets = [0, 0], sizes = [15, 16], strides = [1, 1]} : vector<16x16xf32> to vector<15x16xf32>
    %23 = arith.subf %21, %22 : vector<15x16xf32>
    %24 = math.absf %23 : vector<15x16xf32>
    %25 = vector.shape_cast %24 : vector<15x16xf32> to vector<1x15x16xf32>
    %cst_24 = arith.constant dense<0.000000e+00> : vector<1xf32>
    %26 = vector.multi_reduction <add>, %25, %cst_24 [1, 2] : vector<1x15x16xf32> to vector<1xf32>
    %27 = vector.shape_cast %26 : vector<1xf32> to vector<1x1x1xf32>
    %28 = vector.extract %27[0, 0, 0] : f32 from vector<1x1x1xf32>
    %29 = vector.extract_strided_slice %20 {offsets = [0, 1], sizes = [16, 15], strides = [1, 1]} : vector<16x16xf32> to vector<16x15xf32>
    %30 = vector.extract_strided_slice %20 {offsets = [0, 0], sizes = [16, 15], strides = [1, 1]} : vector<16x16xf32> to vector<16x15xf32>
    %31 = arith.subf %29, %30 : vector<16x15xf32>
    %32 = math.absf %31 : vector<16x15xf32>
    %33 = vector.shape_cast %32 : vector<16x15xf32> to vector<1x16x15xf32>
    %cst_25 = arith.constant dense<0.000000e+00> : vector<1xf32>
    %34 = vector.multi_reduction <add>, %33, %cst_25 [1, 2] : vector<1x16x15xf32> to vector<1xf32>
    %35 = vector.shape_cast %34 : vector<1xf32> to vector<1x1x1xf32>
    %36 = vector.extract %35[0, 0, 0] : f32 from vector<1x1x1xf32>
    %37 = vector.extract_strided_slice %20 {offsets = [1, 1], sizes = [15, 15], strides = [1, 1]} : vector<16x16xf32> to vector<15x15xf32>
    %38 = vector.extract_strided_slice %20 {offsets = [0, 0], sizes = [15, 15], strides = [1, 1]} : vector<16x16xf32> to vector<15x15xf32>
    %39 = arith.subf %37, %38 : vector<15x15xf32>
    %40 = math.absf %39 : vector<15x15xf32>
    %41 = vector.extract_strided_slice %20 {offsets = [1, 0], sizes = [15, 15], strides = [1, 1]} : vector<16x16xf32> to vector<15x15xf32>
    %42 = vector.extract_strided_slice %20 {offsets = [0, 1], sizes = [15, 15], strides = [1, 1]} : vector<16x16xf32> to vector<15x15xf32>
    %43 = arith.subf %41, %42 : vector<15x15xf32>
    %44 = math.absf %43 : vector<15x15xf32>
    %45 = arith.addf %40, %44 : vector<15x15xf32>
    %46 = vector.shape_cast %45 : vector<15x15xf32> to vector<1x15x15xf32>
    %cst_26 = arith.constant dense<0.000000e+00> : vector<1xf32>
    %47 = vector.multi_reduction <add>, %46, %cst_26 [1, 2] : vector<1x15x15xf32> to vector<1xf32>
    %48 = vector.shape_cast %47 : vector<1xf32> to vector<1x1x1xf32>
    %49 = vector.extract %48[0, 0, 0] : f32 from vector<1x1x1xf32>
    %50 = math.absf %20 : vector<16x16xf32>
    %51 = arith.mulf %0, %50 : vector<16x16xf32>
    %52 = vector.shape_cast %51 : vector<16x16xf32> to vector<1x16x16xf32>
    %cst_27 = arith.constant dense<0.000000e+00> : vector<1xf32>
    %53 = vector.multi_reduction <add>, %52, %cst_27 [1, 2] : vector<1x16x16xf32> to vector<1xf32>
    %54 = vector.shape_cast %53 : vector<1xf32> to vector<1x1x1xf32>
    %55 = vector.extract %54[0, 0, 0] : f32 from vector<1x1x1xf32>
    %56 = arith.addf %28, %36 : f32
    %57 = arith.addf %56, %49 : f32
    %cst_28 = arith.constant 2.000000e+00 : f32
    %58 = arith.mulf %cst_28, %57 : f32
    %59 = arith.addf %58, %55 : f32
    %60 = arith.addf %cst_13, %59 : f32
    %cst_29 = arith.constant dense<0.000000e+00> : vector<8x16xf32>
    %61 = tpu.matmul %3, %20, %cst_29 {dimension_numbers = #tpu.dot_dimension_numbers<[1], [0], [0], [1], [0, 0, 1, 1], [], []>} : vector<8x16xf32>, vector<16x16xf32>, vector<8x16xf32> -> vector<8x16xf32>
    %cst_30 = arith.constant dense<0.000000e+00> : vector<8x8xf32>
    %62 = tpu.matmul %61, %4, %cst_30 {dimension_numbers = #tpu.dot_dimension_numbers<[1], [0], [0], [1], [0, 0, 1, 1], [], []>} : vector<8x16xf32>, vector<16x8xf32>, vector<8x8xf32> -> vector<8x8xf32>
    %63 = vector.extract_strided_slice %62 {offsets = [1, 0], sizes = [7, 8], strides = [1, 1]} : vector<8x8xf32> to vector<7x8xf32>
    %64 = vector.extract_strided_slice %62 {offsets = [0, 0], sizes = [7, 8], strides = [1, 1]} : vector<8x8xf32> to vector<7x8xf32>
    %65 = arith.subf %63, %64 : vector<7x8xf32>
    %66 = math.absf %65 : vector<7x8xf32>
    %67 = vector.shape_cast %66 : vector<7x8xf32> to vector<1x7x8xf32>
    %cst_31 = arith.constant dense<0.000000e+00> : vector<1xf32>
    %68 = vector.multi_reduction <add>, %67, %cst_31 [1, 2] : vector<1x7x8xf32> to vector<1xf32>
    %69 = vector.shape_cast %68 : vector<1xf32> to vector<1x1x1xf32>
    %70 = vector.extract %69[0, 0, 0] : f32 from vector<1x1x1xf32>
    %71 = vector.extract_strided_slice %62 {offsets = [0, 1], sizes = [8, 7], strides = [1, 1]} : vector<8x8xf32> to vector<8x7xf32>
    %72 = vector.extract_strided_slice %62 {offsets = [0, 0], sizes = [8, 7], strides = [1, 1]} : vector<8x8xf32> to vector<8x7xf32>
    %73 = arith.subf %71, %72 : vector<8x7xf32>
    %74 = math.absf %73 : vector<8x7xf32>
    %75 = vector.shape_cast %74 : vector<8x7xf32> to vector<1x8x7xf32>
    %cst_32 = arith.constant dense<0.000000e+00> : vector<1xf32>
    %76 = vector.multi_reduction <add>, %75, %cst_32 [1, 2] : vector<1x8x7xf32> to vector<1xf32>
    %77 = vector.shape_cast %76 : vector<1xf32> to vector<1x1x1xf32>
    %78 = vector.extract %77[0, 0, 0] : f32 from vector<1x1x1xf32>
    %79 = vector.extract_strided_slice %62 {offsets = [1, 1], sizes = [7, 7], strides = [1, 1]} : vector<8x8xf32> to vector<7x7xf32>
    %80 = vector.extract_strided_slice %62 {offsets = [0, 0], sizes = [7, 7], strides = [1, 1]} : vector<8x8xf32> to vector<7x7xf32>
    %81 = arith.subf %79, %80 : vector<7x7xf32>
    %82 = math.absf %81 : vector<7x7xf32>
    %83 = vector.extract_strided_slice %62 {offsets = [1, 0], sizes = [7, 7], strides = [1, 1]} : vector<8x8xf32> to vector<7x7xf32>
    %84 = vector.extract_strided_slice %62 {offsets = [0, 1], sizes = [7, 7], strides = [1, 1]} : vector<8x8xf32> to vector<7x7xf32>
    %85 = arith.subf %83, %84 : vector<7x7xf32>
    %86 = math.absf %85 : vector<7x7xf32>
    %87 = arith.addf %82, %86 : vector<7x7xf32>
    %88 = vector.shape_cast %87 : vector<7x7xf32> to vector<1x7x7xf32>
    %cst_33 = arith.constant dense<0.000000e+00> : vector<1xf32>
    %89 = vector.multi_reduction <add>, %88, %cst_33 [1, 2] : vector<1x7x7xf32> to vector<1xf32>
    %90 = vector.shape_cast %89 : vector<1xf32> to vector<1x1x1xf32>
    %91 = vector.extract %90[0, 0, 0] : f32 from vector<1x1x1xf32>
    %92 = math.absf %62 : vector<8x8xf32>
    %93 = arith.mulf %1, %92 : vector<8x8xf32>
    %94 = vector.shape_cast %93 : vector<8x8xf32> to vector<1x8x8xf32>
    %cst_34 = arith.constant dense<0.000000e+00> : vector<1xf32>
    %95 = vector.multi_reduction <add>, %94, %cst_34 [1, 2] : vector<1x8x8xf32> to vector<1xf32>
    %96 = vector.shape_cast %95 : vector<1xf32> to vector<1x1x1xf32>
    %97 = vector.extract %96[0, 0, 0] : f32 from vector<1x1x1xf32>
    %98 = arith.addf %70, %78 : f32
    %99 = arith.addf %98, %91 : f32
    %cst_35 = arith.constant 2.000000e+00 : f32
    %100 = arith.mulf %cst_35, %99 : f32
    %101 = arith.addf %100, %97 : f32
    %102 = arith.addf %cst_14, %101 : f32
    %cst_36 = arith.constant dense<0.000000e+00> : vector<4x8xf32>
    %103 = tpu.matmul %5, %62, %cst_36 {dimension_numbers = #tpu.dot_dimension_numbers<[1], [0], [0], [1], [0, 0, 1, 1], [], []>} : vector<4x8xf32>, vector<8x8xf32>, vector<4x8xf32> -> vector<4x8xf32>
    %cst_37 = arith.constant dense<0.000000e+00> : vector<4x4xf32>
    %104 = tpu.matmul %103, %6, %cst_37 {dimension_numbers = #tpu.dot_dimension_numbers<[1], [0], [0], [1], [0, 0, 1, 1], [], []>} : vector<4x8xf32>, vector<8x4xf32>, vector<4x4xf32> -> vector<4x4xf32>
    %105 = vector.extract_strided_slice %104 {offsets = [1, 0], sizes = [3, 4], strides = [1, 1]} : vector<4x4xf32> to vector<3x4xf32>
    %106 = vector.extract_strided_slice %104 {offsets = [0, 0], sizes = [3, 4], strides = [1, 1]} : vector<4x4xf32> to vector<3x4xf32>
    %107 = arith.subf %105, %106 : vector<3x4xf32>
    %108 = math.absf %107 : vector<3x4xf32>
    %109 = vector.shape_cast %108 : vector<3x4xf32> to vector<1x3x4xf32>
    %cst_38 = arith.constant dense<0.000000e+00> : vector<1xf32>
    %110 = vector.multi_reduction <add>, %109, %cst_38 [1, 2] : vector<1x3x4xf32> to vector<1xf32>
    %111 = vector.shape_cast %110 : vector<1xf32> to vector<1x1x1xf32>
    %112 = vector.extract %111[0, 0, 0] : f32 from vector<1x1x1xf32>
    %113 = vector.extract_strided_slice %104 {offsets = [0, 1], sizes = [4, 3], strides = [1, 1]} : vector<4x4xf32> to vector<4x3xf32>
    %114 = vector.extract_strided_slice %104 {offsets = [0, 0], sizes = [4, 3], strides = [1, 1]} : vector<4x4xf32> to vector<4x3xf32>
    %115 = arith.subf %113, %114 : vector<4x3xf32>
    %116 = math.absf %115 : vector<4x3xf32>
    %117 = vector.shape_cast %116 : vector<4x3xf32> to vector<1x4x3xf32>
    %cst_39 = arith.constant dense<0.000000e+00> : vector<1xf32>
    %118 = vector.multi_reduction <add>, %117, %cst_39 [1, 2] : vector<1x4x3xf32> to vector<1xf32>
    %119 = vector.shape_cast %118 : vector<1xf32> to vector<1x1x1xf32>
    %120 = vector.extract %119[0, 0, 0] : f32 from vector<1x1x1xf32>
    %121 = vector.extract_strided_slice %104 {offsets = [1, 1], sizes = [3, 3], strides = [1, 1]} : vector<4x4xf32> to vector<3x3xf32>
    %122 = vector.extract_strided_slice %104 {offsets = [0, 0], sizes = [3, 3], strides = [1, 1]} : vector<4x4xf32> to vector<3x3xf32>
    %123 = arith.subf %121, %122 : vector<3x3xf32>
    %124 = math.absf %123 : vector<3x3xf32>
    %125 = vector.extract_strided_slice %104 {offsets = [1, 0], sizes = [3, 3], strides = [1, 1]} : vector<4x4xf32> to vector<3x3xf32>
    %126 = vector.extract_strided_slice %104 {offsets = [0, 1], sizes = [3, 3], strides = [1, 1]} : vector<4x4xf32> to vector<3x3xf32>
    %127 = arith.subf %125, %126 : vector<3x3xf32>
    %128 = math.absf %127 : vector<3x3xf32>
    %129 = arith.addf %124, %128 : vector<3x3xf32>
    %130 = vector.shape_cast %129 : vector<3x3xf32> to vector<1x3x3xf32>
    %cst_40 = arith.constant dense<0.000000e+00> : vector<1xf32>
    %131 = vector.multi_reduction <add>, %130, %cst_40 [1, 2] : vector<1x3x3xf32> to vector<1xf32>
    %132 = vector.shape_cast %131 : vector<1xf32> to vector<1x1x1xf32>
    %133 = vector.extract %132[0, 0, 0] : f32 from vector<1x1x1xf32>
    %134 = math.absf %104 : vector<4x4xf32>
    %135 = arith.mulf %2, %134 : vector<4x4xf32>
    %136 = vector.shape_cast %135 : vector<4x4xf32> to vector<1x4x4xf32>
    %cst_41 = arith.constant dense<0.000000e+00> : vector<1xf32>
    %137 = vector.multi_reduction <add>, %136, %cst_41 [1, 2] : vector<1x4x4xf32> to vector<1xf32>
    %138 = vector.shape_cast %137 : vector<1xf32> to vector<1x1x1xf32>
    %139 = vector.extract %138[0, 0, 0] : f32 from vector<1x1x1xf32>
    %140 = arith.addf %112, %120 : f32
    %141 = arith.addf %140, %133 : f32
    %cst_42 = arith.constant 2.000000e+00 : f32
    %142 = arith.mulf %cst_42, %141 : f32
    %143 = arith.addf %142, %139 : f32
    %144 = arith.addf %cst_15, %143 : f32
    %c1_i32 = arith.constant 1 : i32
    %145 = tpu.iota {dimensions = array<i32: 2>} : vector<1x8x128xi32>
    %146 = tpu.iota {dimensions = array<i32: 1>} : vector<1x8x128xi32>
    %c0_i32_43 = arith.constant 0 : i32
    %147 = vector.broadcast %c0_i32_43 : i32 to vector<1x8x128xi32>
    %148 = arith.cmpi eq, %146, %147 : vector<1x8x128xi32>
    %c0_i32_44 = arith.constant 0 : i32
    %149 = vector.broadcast %c0_i32_44 : i32 to vector<1x8x128xi32>
    %150 = arith.cmpi eq, %145, %149 : vector<1x8x128xi32>
    %151 = arith.andi %148, %150 : vector<1x8x128xi1>
    %cst_45 = arith.constant 0.000000e+00 : f32
    %152 = vector.broadcast %19 : f32 to vector<1x8x128xf32>
    %153 = vector.broadcast %cst_45 : f32 to vector<1x8x128xf32>
    %154 = arith.select %151, %152, %153 : vector<1x8x128xi1>, vector<1x8x128xf32>
    %c0_i32_46 = arith.constant 0 : i32
    %155 = vector.broadcast %c0_i32_46 : i32 to vector<1x8x128xi32>
    %156 = arith.cmpi eq, %146, %155 : vector<1x8x128xi32>
    %c1_i32_47 = arith.constant 1 : i32
    %157 = vector.broadcast %c1_i32_47 : i32 to vector<1x8x128xi32>
    %158 = arith.cmpi eq, %145, %157 : vector<1x8x128xi32>
    %159 = arith.andi %156, %158 : vector<1x8x128xi1>
    %cst_48 = arith.constant 0.000000e+00 : f32
    %160 = vector.broadcast %60 : f32 to vector<1x8x128xf32>
    %161 = vector.broadcast %cst_48 : f32 to vector<1x8x128xf32>
    %162 = arith.select %159, %160, %161 : vector<1x8x128xi1>, vector<1x8x128xf32>
    %163 = arith.addf %154, %162 : vector<1x8x128xf32>
    %c0_i32_49 = arith.constant 0 : i32
    %164 = vector.broadcast %c0_i32_49 : i32 to vector<1x8x128xi32>
    %165 = arith.cmpi eq, %146, %164 : vector<1x8x128xi32>
    %c2_i32 = arith.constant 2 : i32
    %166 = vector.broadcast %c2_i32 : i32 to vector<1x8x128xi32>
    %167 = arith.cmpi eq, %145, %166 : vector<1x8x128xi32>
    %168 = arith.andi %165, %167 : vector<1x8x128xi1>
    %cst_50 = arith.constant 0.000000e+00 : f32
    %169 = vector.broadcast %102 : f32 to vector<1x8x128xf32>
    %170 = vector.broadcast %cst_50 : f32 to vector<1x8x128xf32>
    %171 = arith.select %168, %169, %170 : vector<1x8x128xi1>, vector<1x8x128xf32>
    %172 = arith.addf %163, %171 : vector<1x8x128xf32>
    %c0_i32_51 = arith.constant 0 : i32
    %173 = vector.broadcast %c0_i32_51 : i32 to vector<1x8x128xi32>
    %174 = arith.cmpi eq, %146, %173 : vector<1x8x128xi32>
    %c3_i32 = arith.constant 3 : i32
    %175 = vector.broadcast %c3_i32 : i32 to vector<1x8x128xi32>
    %176 = arith.cmpi eq, %145, %175 : vector<1x8x128xi32>
    %177 = arith.andi %174, %176 : vector<1x8x128xi1>
    %cst_52 = arith.constant 0.000000e+00 : f32
    %178 = vector.broadcast %144 : f32 to vector<1x8x128xf32>
    %179 = vector.broadcast %cst_52 : f32 to vector<1x8x128xf32>
    %180 = arith.select %177, %178, %179 : vector<1x8x128xi1>, vector<1x8x128xf32>
    %181 = arith.addf %172, %180 : vector<1x8x128xf32>
    %c0_53 = arith.constant 0 : index
    %c0_54 = arith.constant 0 : index
    %c0_55 = arith.constant 0 : index
    %182 = vector.load %arg10[%c0_53, %c0_54, %c0_55] : memref<1x8x128xf32, #tpu.memory_space<vmem>>, vector<1x8x128xf32>
    tpu.vector_store %arg10[%c0_53, %c0_54, %c0_55], %181 {strides = array<i32>} : memref<1x8x128xf32, #tpu.memory_space<vmem>>, vector<1x8x128xf32>,
    return
  }
  func.func @transform_0(%arg0: i32) -> (i32, i32, i32, i32) {
    %c0_i32 = arith.constant 0 : i32
    %c0_i32_0 = arith.constant 0 : i32
    %c0_i32_1 = arith.constant 0 : i32
    %c0_i32_2 = arith.constant 0 : i32
    return %arg0, %c0_i32, %c0_i32_0, %c0_i32_1 : i32, i32, i32, i32
  }
  func.func @transform_1(%arg0: i32) -> (i32, i32, i32, i32) {
    %c0_i32 = arith.constant 0 : i32
    %c0_i32_0 = arith.constant 0 : i32
    %c0_i32_1 = arith.constant 0 : i32
    %c0_i32_2 = arith.constant 0 : i32
    return %arg0, %c0_i32, %c0_i32_0, %c0_i32_1 : i32, i32, i32, i32
  }
  func.func @transform_2(%arg0: i32) -> (i32, i32) {
    %c0_i32 = arith.constant 0 : i32
    %c0_i32_0 = arith.constant 0 : i32
    %c0_i32_1 = arith.constant 0 : i32
    return %c0_i32, %c0_i32_0 : i32, i32
  }
  func.func @transform_3(%arg0: i32) -> (i32, i32) {
    %c0_i32 = arith.constant 0 : i32
    %c0_i32_0 = arith.constant 0 : i32
    %c0_i32_1 = arith.constant 0 : i32
    return %c0_i32, %c0_i32_0 : i32, i32
  }
  func.func @transform_4(%arg0: i32) -> (i32, i32) {
    %c0_i32 = arith.constant 0 : i32
    %c0_i32_0 = arith.constant 0 : i32
    %c0_i32_1 = arith.constant 0 : i32
    return %c0_i32, %c0_i32_0 : i32, i32
  }
  func.func @transform_5(%arg0: i32) -> (i32, i32) {
    %c0_i32 = arith.constant 0 : i32
    %c0_i32_0 = arith.constant 0 : i32
    %c0_i32_1 = arith.constant 0 : i32
    return %c0_i32, %c0_i32_0 : i32, i32
  }
  func.func @transform_6(%arg0: i32) -> (i32, i32) {
    %c0_i32 = arith.constant 0 : i32
    %c0_i32_0 = arith.constant 0 : i32
    %c0_i32_1 = arith.constant 0 : i32
    return %c0_i32, %c0_i32_0 : i32, i32
  }
  func.func @transform_7(%arg0: i32) -> (i32, i32) {
    %c0_i32 = arith.constant 0 : i32
    %c0_i32_0 = arith.constant 0 : i32
    %c0_i32_1 = arith.constant 0 : i32
    return %c0_i32, %c0_i32_0 : i32, i32
  }
  func.func @transform_8(%arg0: i32) -> (i32, i32) {
    %c0_i32 = arith.constant 0 : i32
    %c0_i32_0 = arith.constant 0 : i32
    %c0_i32_1 = arith.constant 0 : i32
    return %c0_i32, %c0_i32_0 : i32, i32
  }
  func.func @transform_9(%arg0: i32) -> (i32, i32, i32) {
    %c0_i32 = arith.constant 0 : i32
    %c0_i32_0 = arith.constant 0 : i32
    %c0_i32_1 = arith.constant 0 : i32
    return %arg0, %c0_i32, %c0_i32_0 : i32, i32, i32
  }
}

</mosaic_0001>

<bundles_post_ra>
// kernel: tpu_custom_call.1
= control target key start
LH: loop header
LB: loop body
LE: loop exit
PB: predicated region body
PF: predicated region fallthrough
CT: control target
= control target key end

     0   :  { %s1964_s0 = inlined_call_operand.hbm [shape: f32[2,4,16,16], index: 0, kind: input, shape index: {}]   ;;  %s1965_s1 = inlined_call_operand.hbm [shape: f32[2,4,16,16], index: 1, kind: input, shape index: {}]   ;;  %s1966_s2 = inlined_call_operand.vmem [shape: f32[16,16], index: 2, kind: input, shape index: {}]   ;;  %s1967_s3 = inlined_call_operand.vmem [shape: f32[8,8], index: 3, kind: input, shape index: {}]   ;;  %s1968_s4 = inlined_call_operand.vmem [shape: f32[4,4], index: 4, kind: input, shape index: {}]   ;;  %s1969_s5 = inlined_call_operand.vmem [shape: f32[8,16], index: 5, kind: input, shape index: {}]   ;;  %s1970_s6 = inlined_call_operand.vmem [shape: f32[16,8], index: 6, kind: input, shape index: {}]   ;;  %s1971_s7 = inlined_call_operand.vmem [shape: f32[4,8], index: 7, kind: input, shape index: {}]   ;;  %s1972_s8 = inlined_call_operand.vmem [shape: f32[8,4], index: 8, kind: input, shape index: {}]   ;;  %s1973_s9 = inlined_call_operand.hbm [shape: f32[2,8,128], index: 9, kind: output, shape index: {}]  }
   0x1   :  { %1982 = sst [smem:[#allocation14_spill]] %s1964_s0 }
   0x2   :  { %1983 = sst [smem:[#allocation15_spill]] %s1965_s1 }
   0x3   :  { %1984 = sst [smem:[#allocation16_spill]] %s1966_s2 }
   0x4   :  { %14 = vsyncpa [#allocation3], 0 }
   0x5   :  { %16 = vsyncpa [#allocation3 + $0x1], 0 }
   0x6   :  { %17 = vsyncpa [#allocation6], 0 }
   0x7   :  { %19 = vsyncpa [#allocation6 + $0x1], 0 }
   0x8   :  { %20 = vsyncpa [#allocation4], 0 }
   0x9   :  { %22 = vsyncpa [#allocation4 + $0x1], 0  ;;  %s1550_s30 = smov 0   ;;  %s1552_s10 = smov 0  }
   0xa   :  { %s1554_s11 = smov 0   ;;  %s1556_s12 = smov 0  }
   0xb LB: > { %1985 = sst [smem:[#allocation11_spill]] %s1484_s11  ;;  %s1571_s13 = sadd.s32 4294967295, %s1488_s12   ;;  %s1488_s12 = sphi %s1556_s12, %s2005_s12   ;;  %s1484_s11 = sphi %s1554_s11, %s2007_s11   ;;  %s1480_s10 = sphi %s1552_s10, %s2009_s10   ;;  %s1476_s30 = sphi %s1550_s30, %s2008_s30  }
   0xc   : > { %s1211_s14 = sadd.s32 4294967294, %s1488_s12   ;;  %s1575_s15 = sadd.s32 1, %s1488_s12  }
   0xd   : > { %1986 = sst [smem:[#allocation12_spill]] %s1575_s15  ;;  %s35_s16 = sadd.s32 1, %s1484_s11 }
   0xe   : > { %s32_s17 = ssub.s32 %s1488_s12, %s1575_s15  ;;  %p42_p0 = scmp.ne.s32.totalorder %s1484_s11, %s1480_s10 }
   0xf   : > { %p33_p1 = scmp.eq.s32.totalorder %s32_s17, 0  ;;  %p43_p2 = scmp.eq.s32.totalorder %s1488_s12, 0 }
  0x10   : > { %p48_p3 = scmp.ne.s32.totalorder %s1480_s10, %s1476_s30  ;;  %p49_p4 = scmp.eq.s32.totalorder %s1571_s13, 0 }
  0x11   : > { %s1587_s18 = scalar_select %p33_p1, %s1484_s11, %s35_s16  }
  0x12   : > { %p1589_p5 = por %p43_p2, %p42_p0  ;;  %p1593_p6 = por %p49_p4, %p48_p3 }
  0x13   : > { %1987 = sst [smem:[#allocation13_spill]] %s1587_s18  ;;  %p245_p7 = scmp.eq.s32.totalorder %s1571_s13, 1 }
  0x14   : > { %s1989_s20 = scalar_select %p1593_p6, 1, 0 }
  0x15   : > { %p251_p8 = scmp.eq.s32.totalorder %s1211_s14, 1  ;;  %p1317_p10 = scmp.lt.s32.totalorder %s1488_s12, 2 }
  0x16   : > { %p1600_p11 = por %p245_p7, %p42_p0  ;;  %s1609_s23 = sand.u32 1, %s1484_s11  }
  0x17   : > { %p1604_p12 = por %p251_p8, %p48_p3  ;;  %s1975_s24 = sshll.u32 %s1488_s12, 10 }
  0x18   : > { %s1990_s21 = scalar_select %p1600_p11, 1, 0 }
  0x19   : > { %s1991_s22 = scalar_select %p1604_p12, 1, 0 }
  0x1a   : > { %s1974_s25 = sshll.u32 %s1609_s23, 6  ;;  %s1992_s0 = sld [smem:[#allocation14_spill]] }
  0x1b   : > { %s296_s29 = scalar_lea.vmem [#allocation2], %s1974_s25  ;;  %p1624_p13 = pnand %p1317_p10, %p1589_p5 }
  0x1c   : > { %s303_s14 = sshll.u32 %s296_s29, 4  ;;  %s1628_s14 = int_to_ptr.vmem [resolvable:$true] %s303_s14 }
  0x1d   : > { %p1360_p1 = pneg %p1624_p13 }
  0x20   : > { %s1618_s28 = scalar_lea.hbm %s1992_s0, %s1975_s24  ;;  %s1363_s19 = scalar_lea.hbm %s1992_s0, 2048 }
  0x21   : > { %s1358_s26 = scalar_lea.hbm %s1618_s28, 1024  ;;  %p1364_p4 = scmp.lt.u32.totalorder %s1618_s28, %s1992_s0 }
  0x22   : > { %p1359_p0 = scmp.ne.s32.totalorder %s1618_s28, %s1358_s26  ;;  %p1365_p5 = scmp.lt.u32.totalorder %s1363_s19, %s1358_s26 }
  0x23   : > { %p1367_p8 = scmp.lt.u32.totalorder %s1358_s26, %s1618_s28 }
  0x24   : > { %p1361_p2 = pnand %p1360_p1, %p1359_p0  ;;  %p1366_p7 = por %p1365_p5, %p1364_p4 }
  0x26   : > { %p1362_p3 = pneg %p1361_p2  ;;  %p1368_p10 = por %p1367_p8, %p1366_p7 }
  0x28   : > { %p1369_p9 = pnand %p1368_p10, %p1362_p3 }
  0x2a   : > { %1372 = shalt.err (!%p1369_p9)
}
  0x2b   : > { %s1373_s17 = scalar_lea.vmem %s1628_s14, 1024  ;;  %s1490_s27 = smov [#allocation2]  }
  0x2c   : > { %p1374_p0 = scmp.ne.s32.totalorder %s1628_s14, %s1373_s17  ;;  %s1378_s29 = sshll.u32 %s1490_s27, 4  ;;  %s1379_s29 = int_to_ptr.vmem [resolvable:$false] %s1378_s29 }
  0x2d   : > { %s1380_s24 = scalar_lea.vmem %s1379_s29, 2048  ;;  %p1381_p11 = scmp.lt.s32.totalorder %s1628_s14, %s1379_s29 }
  0x2e   : > { %p1376_p2 = pnand %p1374_p0, %p1360_p1  ;;  %p1382_p4 = scmp.lt.s32.totalorder %s1380_s24, %s1373_s17 }
  0x30   : > { %p1377_p12 = pneg %p1376_p2  ;;  %p1383_p5 = por %p1382_p4, %p1381_p11 }
  0x32   : > { %p1384_p7 = pnand %p1383_p5, %p1377_p12 }
  0x34   : > { %1387 = shalt.err (!%p1384_p7)
}
  0x35   : > { %s1980_s25 = smov 128   ;;  %s1492_s26 = smov 8  }
  0x36   : > { %s1994_s17 = scalar_lea.sflag [#allocation3], %s1609_s23  ;;  %p1220_p9 = scmp.ge.s32.totalorder %s1488_s12, 1 }
  0x37   : > { %1309 = dma.hbm_to_vmem [thread:$0]  (!%p1624_p13), %s1618_s28, 1024, %s1628_s14, %s1994_s17, %s1980_s25, %s1980_s25, %s1492_s26  }
  0x38   : > { %p332_p11 = scmp.lt.s32.totalorder %s1488_s12, 3  ;;  %s1996_s27 = sshll.u32 %s1488_s12, 10 }
  0x39   : > { %s1997_s1 = sld [smem:[#allocation15_spill]]  ;;  %s1998_s18 = sshll.u32 %s1609_s23, 6 }
  0x3a   : > { %p1663_p12 = pnand %p1220_p9, %p332_p11  ;;  %s317_s11 = scalar_lea.vmem [#allocation5], %s1998_s18 }
  0x3b   : > { %s324_s15 = sshll.u32 %s317_s11, 4  ;;  %s314_s28 = scalar_lea.sflag [#allocation6], %s1609_s23  ;;  %s1676_s15 = int_to_ptr.vmem [resolvable:$true] %s324_s15 }
  0x3f   : > { %s1672_s0 = scalar_lea.hbm %s1997_s1, %s1996_s27  ;;  %s1393_s27 = scalar_lea.hbm %s1997_s1, 2048 }
  0x40   : > { %s1388_s14 = scalar_lea.hbm %s1672_s0, 1024  ;;  %p1394_p0 = scmp.lt.u32.totalorder %s1672_s0, %s1997_s1 }
  0x41   : > { %p1389_p3 = scmp.ne.s32.totalorder %s1672_s0, %s1388_s14  ;;  %p1395_p2 = scmp.lt.u32.totalorder %s1393_s27, %s1388_s14 }
  0x42   : > { %p1397_p5 = scmp.lt.u32.totalorder %s1388_s14, %s1672_s0 }
  0x43   : > { %p1391_p8 = pnand %p1389_p3, %p1360_p1  ;;  %p1396_p4 = por %p1395_p2, %p1394_p0 }
  0x45   : > { %p1392_p10 = pneg %p1391_p8  ;;  %p1398_p7 = por %p1397_p5, %p1396_p4 }
  0x47   : > { %p1399_p9 = pnand %p1398_p7, %p1392_p10 }
  0x49   : > { %1402 = shalt.err (!%p1399_p9)
}
  0x4a   : > { %s1403_s11 = scalar_lea.vmem %s1676_s15, 1024  ;;  %s1493_s18 = smov [#allocation5]  }
  0x4b   : > { %p1404_p11 = scmp.ne.s32.totalorder %s1676_s15, %s1403_s11  ;;  %s1408_s17 = sshll.u32 %s1493_s18, 4  ;;  %s1409_s17 = int_to_ptr.vmem [resolvable:$false] %s1408_s17 }
  0x4c   : > { %s1410_s25 = scalar_lea.vmem %s1409_s17, 2048  ;;  %p1411_p6 = scmp.lt.s32.totalorder %s1676_s15, %s1409_s17 }
  0x4d   : > { %p1406_p3 = pnand %p1404_p11, %p1360_p1  ;;  %p1412_p0 = scmp.lt.s32.totalorder %s1410_s25, %s1403_s11 }
  0x4f   : > { %p1407_p8 = pneg %p1406_p3  ;;  %p1413_p2 = por %p1412_p0, %p1411_p6 }
  0x51   : > { %p1414_p4 = pnand %p1413_p2, %p1407_p8 }
  0x53   : > { %1417 = shalt.err (!%p1414_p4)
}
  0x54   : > { %s1999_s14 = smov 128   ;;  %336 = sbr.rel (%p1663_p12) target bundleno = 1546 (0x60a), region = 56 }
  0x55   : > { %1312 = dma.hbm_to_vmem [thread:$0]  (!%p1624_p13), %s1672_s0, 1024, %s1676_s15, %s314_s28, %s1999_s14, %s1999_s14, %s1492_s26  }
  0x56   : > { %s1710_s29 = sand.u32 (!%p1663_p12), 1, %s1480_s10   ;;  %p2000_p6 = scmp.ne.s32.totalorder (!%p1663_p12), %s1989_s20, 0 }
  0x57   : > { %s1221_s27 = sshll.u32 (!%p1663_p12), %s1710_s29, 6  ;;  %s339_s24 = scalar_lea.sflag (!%p1663_p12), [#allocation3], %s1710_s29 }
  0x58   : > { %s342_s16 = scalar_lea.vmem (!%p1663_p12), [#allocation2], %s1221_s27 }
  0x5b   : > { %1463 = dma.done.wait (%p2000_p6), %s339_s24, 1024  }
  0x5c   : > { %1465 = vsyncadd (%p2000_p6), %s339_s24, 4294966272  ;;  %s348_s0 = scalar_lea.sflag [#allocation6], %s1710_s29  ;;  %s351_s15 = scalar_lea.vmem [#allocation5], %s1221_s27 }
  0x5d   : > { %1467 = dma.done.wait (%p2000_p6), %s348_s0, 1024  }
  0x5e   : > { %1469 = vsyncadd (%p2000_p6), %s348_s0, 4294966272  ;;  %v1494_v0 = vmov 0.0|0.0   ;;  %vm1495_vm0 = vmmov 0   ;;  %v1496_v1 = vmov 0.0   ;;  %v400_v2 = vld [vmem:[%s342_s16] sm:$0xff]  ;;  %v401_v3 = vld [vmem:[%s342_s16 + $0x8] sm:$0xff] }
  0x5f   : > { %1268 = vmatprep.subr.bf16.mxu0 %v1494_v0  ;;  %1248 = vmatprep.mubr.msk.f32.mxu0 %vm1495_vm0, %v1496_v1  ;;  %v402_v4 = vld [vmem:[%s342_s16 + $0x10] sm:$0xff]  ;;  %v403_v5 = vld [vmem:[%s342_s16 + $0x18] sm:$0xff]  ;;  %v404_v6 = vld [vmem:[%s342_s16 + $0x20] sm:$0xff]  ;;  %vm432_vm1 = vcmask 130048   ;;  %vm474_vm2 = vcmask 1040384   ;;  %s1497_s18 = smov 127  }
  0x60   : > { %1271 = vmatprep.subr.bf16.mxu1 %v1494_v0  ;;  %1255 = vmatprep.mubr.msk.f32.mxu1 %vm1495_vm0, %v1496_v1  ;;  %v405_v7 = vld [vmem:[%s342_s16 + $0x28] sm:$0xff]  ;;  %v406_v8 = vld [vmem:[%s342_s16 + $0x30] sm:$0xff]  ;;  %v407_v9 = vld [vmem:[%s342_s16 + $0x38] sm:$0xff]  ;;  %s1498_s17 = smov 1   ;;  %vm829_vm3 = vcmask 64512   ;;  %vm486_vm4 = vcmask 1046528  }
  0x61   : > { %v408_v10 = vld [vmem:[%s351_s15] sm:$0xff]  ;;  %v409_v11 = vld [vmem:[%s351_s15 + $0x8] sm:$0xff]  ;;  %v410_v12 = vld [vmem:[%s351_s15 + $0x10] sm:$0xff]  ;;  %vm523_vm5 = vcmask 121856   ;;  %vm578_vm6 = vcmask 120832   ;;  %vm765_vm7 = vcmask 63488  }
  0x62   : > { %v411_v13 = vld [vmem:[%s351_s15 + $0x18] sm:$0xff]  ;;  %v1727_v14 = vsub.f32 %v400_v2, %v408_v10  ;;  %v412_v15 = vld [vmem:[%s351_s15 + $0x20] sm:$0xff]  ;;  %v413_v16 = vld [vmem:[%s351_s15 + $0x28] sm:$0xff]  ;;  %v1729_v18 = vsub.f32 %v401_v3, %v409_v11  ;;  %v1731_v19 = vsub.f32 %v402_v4, %v410_v12  ;;  %vm816_vm8 = vcmask 55296   ;;  %s2001_s2 = sld [smem:[#allocation16_spill]]  ;;  %p2002_p1 = scmp.ne.s32.totalorder %s1990_s21, 0 }
  0x63   : > { %v414_v17 = vld [vmem:[%s351_s15 + $0x30] sm:$0xff]  ;;  %v1733_v20 = vsub.f32 %v403_v5, %v411_v13  ;;  %v415_v21 = vld [vmem:[%s351_s15 + $0x38] sm:$0xff]  ;;  %v1735_v22 = vsub.f32 %v404_v6, %v412_v15  ;;  %v1737_v23 = vsub.f32 %v405_v7, %v413_v16  ;;  %v396_v26 = vld [vmem:[%s1970_s6] sm:$0xff]  ;;  %vm999_vm9 = vcmask 26624  }
  0x64   : > { %v1739_v24 = vsub.f32 %v406_v8, %v414_v17  ;;  %v458_v25 = vsel %vm432_vm1, %v1727_v14, 0.0  ;;  %v1746_v27 = vsub.f32 %v407_v9, %v415_v21  ;;  %v459_v28 = vsel %vm432_vm1, %v1731_v19, 0.0  ;;  %v397_v31 = vld [vmem:[%s1970_s6 + $0x8] sm:$0xff]  ;;  %v395_v44 = vld [vmem:[%s1969_s5] sm:$0xff] }
  0x65   : > { %v465_v29 = vsel %vm432_vm1, %v1729_v18, 0.0  ;;  %v466_v30 = vsel %vm432_vm1, %v1733_v20, 0.0  ;;  %v460_v32 = vadd.f32 %v459_v28, %v458_v25  ;;  %v461_v33 = vsel %vm432_vm1, %v1735_v22, 0.0  ;;  %v398_v53 = vld [vmem:[%s1971_s7] sm:$0xf] }
  0x66   : > { %v467_v34 = vadd.f32 %v466_v30, %v465_v29  ;;  %v463_v35 = vsel %vm432_vm1, %v1739_v24, 0.0  ;;  %v468_v36 = vsel %vm432_vm1, %v1737_v23, 0.0  ;;  %v470_v37 = vsel %vm432_vm1, %v1746_v27, 0.0  ;;  %v399_v58 = vld [vmem:[%s1972_s8] sm:$0xff] }
  0x67   : > { %v1272_v38 = vpack.c.bf16 %v397_v31, %v396_v26  ;;  %v462_v39 = vadd.f32 %v461_v33, %v460_v32  ;;  %vm493_vm10 = vcmask 129024   ;;  %vm785_vm11 = vcmask 56320  }
  0x68   : > { %v469_v40 = vadd.f32 %v468_v36, %v467_v34  ;;  %vm1019_vm12 = vcmask 19456   ;;  %vm1063_vm13 = vcmask 27648   ;;  %vm1050_vm14 = vcmask 18432  }
  0x69   : > { %1273 = vmatpush3.bf16.msra.mxu1 %v1272_v38  ;;  %v1765_v41 = vadd.f32 %v463_v35, %v462_v39 }
  0x6a   : > { %v1767_v42 = vadd.f32 %v470_v37, %v469_v40  ;;  %1263 = vmatprep.subr.mxu1 %v1496_v1 }
  0x6b   : > { %v1780_v45 = vrot.slane %v1765_v41, 7 }
  0x6c   : > { %v1269_v43 = vpack.c.bf16 %v1767_v42, %v1765_v41  ;;  %v476_v46 = vrot.slane %v1767_v42, 7 }
  0x6d   : > { %546 = vrot.lane.b32.xlu0 %v1780_v45, %s1497_s18 }
  0x6e   : > { %1270 = vmatpush3.bf16.msra.mxu0 %v1269_v43  ;;  %v1786_v47 = vsel %vm474_vm2, %v1780_v45, %v476_v46 }
  0x6f   : > { %1258 = vmatprep.subr.mxu0 %v1496_v1 }
  0x71   : > { %1249 = vmatmul.mubr.msk.f32.vlgmr.msra.gmra.mrb[0].mxu0 %vm432_vm1, %v395_v44  ;;  %548 = vrot.lane.b32.xlu0 %v1786_v47, %s1497_s18 }
  0x72   : > { %1260 = vmatprep.mubr.msk.f32.mxu0 %vm1495_vm0, %v1496_v1 }
  0x75   : > { %536 = vrot.lane.b32.xlu0 %v1780_v45, %s1498_s17 }
  0x79   : > { %505 = vrot.lane.b32.xlu0 %v1765_v41, %s1498_s17 }
  0xdf   : > { %v547_v48 = vpop.permute.xlu0 %546 }
  0xe0   : > { %v552_v49 = vsub.f32 %v1765_v41, %v547_v48 }
  0xe2   : > { %v554_v50 = vand.u32 2147483647, %v552_v49 }
  0xe3   : > { %v549_v61 = vpop.permute.xlu0 %548 }
  0xe4   : > { %558 = vrot.lane.b32.xlu0 %v554_v50, %s1498_s17  ;;  %v553_v5 = vsub.f32 %v1767_v42, %v549_v61 }
  0xe6   : > { %v555_v7 = vand.u32 2147483647, %v553_v5 }
  0xe7   : > { %v537_v62 = vpop.permute.xlu0 %536 }
  0xe8   : > { %v542_v16 = vsub.f32 %v1765_v41, %v537_v62 }
  0xea   : > { %v544_v28 = vand.u32 2147483647, %v542_v16 }
  0xeb   : > { %v506_v2 = vpop.permute.xlu0 %505 }
  0xec   : > { %v511_v3 = vsub.f32 %v1765_v41, %v506_v2  ;;  %v427_v2 = vand.u32 2147483647, %v1733_v20  ;;  %v431_v20 = vand.u32 2147483647, %v1746_v27 }
  0xee   : > { %v513_v6 = vand.u32 2147483647, %v511_v3  ;;  %v438_v5 = vsel %vm432_vm1, %v427_v2, 0.0 }
 0x144   : > { %v680_v51 = vpop.f32.mrb[0].mxu0 }
 0x145   : > { %v1250_v52 = vpop.f32.mrb[1].mxu0  ;;  %1256 = vmatmul.mubr.msk.f32.vlgmr.msra.gmra.mrb[0].mxu1 %vm432_vm1, %v680_v51 }
 0x146   : > { %1265 = vmatprep.mubr.msk.f32.mxu1 %vm1495_vm0, %v1496_v1  ;;  %1264 = vmatpush3.msra.mxu1 %v399_v58 }
 0x156   : > { %v559_v11 = vpop.permute.xlu0 %558 }
 0x157   : > { %v564_v31 = vadd.f32 %v559_v11, %v544_v28 }
 0x159   : > { %v568_v36 = vrot.slane %v564_v31, 1 }
 0x218   : > { %v1802_v54 = vpop.f32.mrb[0].mxu1 }
 0x219   : > { %v1257_v55 = vpop.f32.mrb[1].mxu1  ;;  %1259 = vmatpush3.msra.mxu0 %v1802_v54  ;;  %v1806_v56 = vrot.slane %v1802_v54, 7 }
 0x21a   : > { %1261 = vmatmul.mubr.msk.f32.vlgmr.msra.gmra.mrb[2].mxu0 %vm829_vm3, %v398_v53  ;;  %v424_v53 = vand.u32 2147483647, %v1727_v14  ;;  %v425_v55 = vand.u32 2147483647, %v1729_v18  ;;  %v428_v18 = vand.u32 2147483647, %v1735_v22 }
 0x21b   : > { %796 = vrot.lane.b32.xlu0 %v1806_v56, %s1498_s17  ;;  %801 = vrot.lane.b32.xlu1 %v1806_v56, %s1497_s18  ;;  %v760_v57 = vsub.f32 %v1802_v54, %v1806_v56  ;;  %v446_v22 = vsel %vm432_vm1, %v431_v20, 0.0 }
 0x21c   : > { %v433_v61 = vsel %vm432_vm1, %v424_v53, 0.0  ;;  %v434_v62 = vsel %vm432_vm1, %v425_v55, 0.0 }
 0x21d   : > { %v761_v31 = vand.u32 2147483647, %v760_v57 }
 0x28d   : > { %v802_v8 = vpop.permute.xlu1 %801  ;;  %v797_v12 = vpop.permute.xlu0 %796 }
 0x28e   : > { %v804_v9 = vsub.f32 %v1802_v54, %v802_v8  ;;  %v799_v38 = vsub.f32 %v1802_v54, %v797_v12  ;;  %v440_v8 = vsel %vm432_vm1, %v428_v18, 0.0 }
 0x290   : > { %v805_v10 = vand.u32 2147483647, %v804_v9  ;;  %v800_v48 = vand.u32 2147483647, %v799_v38  ;;  %v430_v9 = vand.u32 2147483647, %v1739_v24 }
 0x292   : > { %v444_v12 = vsel %vm432_vm1, %v430_v9, 0.0 }
 0x2ed   : > { %v914_v59 = vpop.f32.mrb[2].mxu0 }
 0x2ee   : > { %1266 = vmatmul.mubr.msk.f32.vlgmr.msra.gmra.mrb[2].mxu1 %vm829_vm3, %v914_v59  ;;  %v1262_v60 = vpop.f32.mrb[3].mxu0 }
 0x2ef   : > { %v426_v60 = vand.u32 2147483647, %v1731_v19 }
 0x2f1   : > { %v436_v3 = vsel %vm432_vm1, %v426_v60, 0.0  ;;  %v827_v60 = vand.u32 2147483647, %v1802_v54 }
 0x3c1   : > { %v1819_v63 = vpop.f32.mrb[2].mxu1 }
 0x3c2   : > { %v1822_v0 = vrot.slane %v1819_v63, 7  ;;  %v1267_v1 = vpop.f32.mrb[3].mxu1 }
 0x3c3   : > { %v435_v1 = vadd.f32 %v434_v62, %v433_v61  ;;  %v393_v62 = vld [vmem:[%s1967_s3] sm:$0xff] }
 0x3c4   : > { %1030 = vrot.lane.b32.xlu0 %v1822_v0, %s1498_s17  ;;  %1035 = vrot.lane.b32.xlu1 %v1822_v0, %s1497_s18  ;;  %v994_v4 = vsub.f32 %v1819_v63, %v1822_v0  ;;  %v828_v2 = vmul.f32 %v827_v60, %v393_v62 }
 0x3c5   : > { %v437_v14 = vadd.f32 %v436_v3, %v435_v1 }
 0x3c6   : > { %v830_v3 = vsel %vm829_vm3, %v828_v2, 0.0 }
 0x3c8   : > { %1010 = vrot.lane.b32.xlu0 %v1819_v63, %s1498_s17  ;;  %538 = vrot.lane.b32.xlu1 %v1786_v47, %s1498_s17 }
 0x3cc   : > { %507 = vrot.lane.b32.xlu1 %v1767_v42, %s1498_s17  ;;  %517 = vrot.lane.b32.xlu0 %v513_v6, %s1497_s18  ;;  %v439_v6 = vadd.f32 %v438_v5, %v437_v14  ;;  %v1061_v14 = vand.u32 2147483647, %v1819_v63 }
 0x3ce   : > { %v441_v19 = vadd.f32 %v440_v8, %v439_v6 }
 0x3d0   : > { %560 = vrot.lane.b32.xlu1 %v555_v7, %s1498_s17  ;;  %v429_v7 = vand.u32 2147483647, %v1737_v23 }
 0x3d4   : > { %776 = vrot.lane.b32.xlu1 %v1802_v54, %s1498_s17 }
 0x3d8   : > { %807 = vrot.lane.b32.xlu1 %v805_v10, %s1498_s17  ;;  %v442_v10 = vsel %vm432_vm1, %v429_v7, 0.0 }
 0x3d9   : > { %v443_v11 = vadd.f32 %v442_v10, %v441_v19 }
 0x436   : > { %v1031_v13 = vpop.permute.xlu0 %1030  ;;  %v1036_v15 = vpop.permute.xlu1 %1035 }
 0x437   : > { %v1033_v17 = vsub.f32 %v1819_v63, %v1031_v13  ;;  %v1038_v21 = vsub.f32 %v1819_v63, %v1036_v15  ;;  %v445_v13 = vadd.f32 %v444_v12, %v443_v11 }
 0x439   : > { %v1039_v25 = vand.u32 2147483647, %v1038_v21  ;;  %v447_v15 = vadd.f32 %v446_v22, %v445_v13  ;;  %v1034_v16 = vand.u32 2147483647, %v1033_v17 }
 0x43a   : > { %v539_v26 = vpop.permute.xlu1 %538  ;;  %v1011_v43 = vpop.permute.xlu0 %1010 }
 0x43b   : > { %v543_v29 = vsub.f32 %v1767_v42, %v539_v26  ;;  %1041 = vrot.lane.b32.xlu1 %v1039_v25, %s1498_s17  ;;  %v1013_v50 = vsub.f32 %v1819_v63, %v1011_v43 }
 0x43d   : > { %v545_v32 = vand.u32 2147483647, %v543_v29  ;;  %v1014_v59 = vand.u32 2147483647, %v1013_v50  ;;  %v392_v50 = vld [vmem:[%s2001_s2 + $0x8] sm:$0xff] }
 0x43e   : > { %v508_v30 = vpop.permute.xlu1 %507  ;;  %v518_v26 = vpop.permute.xlu0 %517 }
 0x43f   : > { %v512_v33 = vsub.f32 %v1767_v42, %v508_v30  ;;  %v524_v24 = vsel %vm523_vm5, %v518_v26, 0.0 }
 0x441   : > { %v514_v34 = vand.u32 2147483647, %v512_v33 }
 0x442   : > { %v561_v35 = vpop.permute.xlu1 %560 }
 0x443   : > { %v565_v37 = vadd.f32 %v561_v35, %v545_v32  ;;  %519 = vrot.lane.b32.xlu1 %v514_v34, %s1497_s18  ;;  %v763_v35 = vrot.slane %v761_v31, 1 }
 0x445   : > { %v569_v39 = vrot.slane %v565_v37, 1  ;;  %v480_v37 = vsub.f32 %v1765_v41, %v1780_v45  ;;  %v766_v38 = vsel %vm765_vm7, %v763_v35, 0.0  ;;  %v590_v45 = vand.u32 2147483647, %v1765_v41 }
 0x446   : > { %v777_v40 = vpop.permute.xlu1 %776 }
 0x447   : > { %v779_v44 = vsub.f32 %v1802_v54, %v777_v40  ;;  %573 = vrot.lane.b32.xlu1 %v569_v39, %s1497_s18  ;;  %v570_v46 = vsel %vm486_vm4, %v568_v36, %v569_v39  ;;  %v481_v36 = vsub.f32 %v1767_v42, %v1786_v47  ;;  %v995_v39 = vand.u32 2147483647, %v994_v4  ;;  %v391_v4 = vld [vmem:[%s2001_s2] sm:$0xff] }
 0x448   : > { %571 = vrot.lane.b32.xlu0 %v570_v46, %s1497_s18  ;;  %v482_v40 = vand.u32 2147483647, %v480_v37  ;;  %v592_v53 = vmul.f32 %v590_v45, %v391_v4  ;;  %v394_v54 = vld [vmem:[%s1968_s4] sm:$0xf] }
 0x449   : > { %v780_v49 = vand.u32 2147483647, %v779_v44  ;;  %v483_v57 = vand.u32 2147483647, %v481_v36  ;;  %v997_v44 = vrot.slane %v995_v39, 1  ;;  %v1062_v6 = vmul.f32 %v1061_v14, %v394_v54 }
 0x44a   : > { %v808_v51 = vpop.permute.xlu1 %807  ;;  %v487_v46 = vrot.slane %v482_v40, 1  ;;  %v594_v41 = vsel %vm432_vm1, %v592_v53, 0.0 }
 0x44b   : > { %v810_v52 = vadd.f32 %v808_v51, %v800_v48  ;;  %v488_v48 = vrot.slane %v483_v57, 1  ;;  %v1000_v47 = vsel %vm999_vm9, %v997_v44, 0.0  ;;  %v1064_v7 = vsel %vm1063_vm13, %v1062_v6, 0.0 }
 0x44c   : > { %782 = vrot.lane.b32.xlu0 %v780_v49, %s1497_s18  ;;  %v591_v49 = vand.u32 2147483647, %v1767_v42 }
 0x44d   : > { %v812_v58 = vrot.slane %v810_v52, 1  ;;  %v489_v0 = vsel %vm486_vm4, %v487_v46, %v488_v48  ;;  %v494_v52 = vsel %vm493_vm10, %v488_v48, 0.0 }
 0x44e   : > { %v492_v51 = vsel %vm432_vm1, %v489_v0, 0.0  ;;  %v593_v55 = vmul.f32 %v591_v49, %v392_v50 }
 0x44f   : > { %813 = vrot.lane.b32.xlu1 %v812_v58, %s1497_s18  ;;  %v495_v58 = vadd.f32 %v494_v52, %v492_v51 }
 0x450   : > { %1016 = vrot.lane.b32.xlu0 %v1014_v59, %s1497_s18  ;;  %v595_v42 = vsel %vm432_vm1, %v593_v55, 0.0 }
 0x451   : > { %v596_v59 = vadd.f32 %v595_v42, %v594_v41 }
 0x46f   : > { %448 = vadd.xlane.f32.xlu0 %v447_v15 }
 0x4ad   : > { %v1042_v21 = vpop.permute.xlu1 %1041 }
 0x4ae   : > { %v1044_v23 = vadd.f32 %v1042_v21, %v1034_v16 }
 0x4b0   : > { %v1046_v25 = vrot.slane %v1044_v23, 1 }
 0x4b2   : > { %1047 = vrot.lane.b32.xlu1 %v1046_v25, %s1497_s18 }
 0x4b5   : > { %v520_v28 = vpop.permute.xlu1 %519 }
 0x4b6   : > { %v525_v29 = vsel %vm523_vm5, %v520_v28, 0.0 }
 0x4b7   : > { %v526_v30 = vadd.f32 %v525_v29, %v524_v24 }
 0x4b9   : > { %527 = vadd.xlane.f32.xlu0 %v526_v30  ;;  %v574_v27 = vpop.permute.xlu1 %573 }
 0x4ba   : > { %v572_v32 = vpop.permute.xlu0 %571  ;;  %v579_v17 = vsel %vm578_vm6, %v574_v27, 0.0 }
 0x4bb   : > { %v577_v33 = vsel %vm523_vm5, %v572_v32, 0.0 }
 0x4bc   : > { %v580_v34 = vadd.f32 %v579_v17, %v577_v33 }
 0x4be   : > { %581 = vadd.xlane.f32.xlu0 %v580_v34  ;;  %v783_v61 = vpop.permute.xlu0 %782 }
 0x4bf   : > { %v786_v1 = vsel %vm785_vm11, %v783_v61, 0.0 }
 0x4c1   : > { %v814_v56 = vpop.permute.xlu1 %813 }
 0x4c2   : > { %767 = vadd.xlane.f32.xlu0 %v766_v38  ;;  %v817_v43 = vsel %vm816_vm8, %v814_v56, 0.0  ;;  %v1017_v18 = vpop.permute.xlu0 %1016 }
 0x4c3   : > { %v1020_v5 = vsel %vm1019_vm12, %v1017_v18, 0.0 }
 0x4c6   : > { %818 = vadd.xlane.f32.xlu0 %v817_v43 }
 0x4ca   : > { %1001 = vadd.xlane.f32.xlu0 %v1000_v47 }
 0x4d6   : > { %496 = vadd.xlane.f32.xlu1 %v495_v58 }
 0x4da   : > { %597 = vadd.xlane.f32.xlu1 %v596_v59 }
 0x4de   : > { %787 = vadd.xlane.f32.xlu1 %v786_v1 }
 0x4e2   : > { %831 = vadd.xlane.f32.xlu1 %v830_v3 }
 0x4e6   : > { %1021 = vadd.xlane.f32.xlu1 %v1020_v5 }
 0x4ea   : > { %1065 = vadd.xlane.f32.xlu1 %v1064_v7 }
 0x4fc   : > { %v449_v8 = vpop.xlane.xlu0 %448 }
 0x4fd   : > { %v450_v19 = vrot.slane %v449_v8, 4 }
 0x4ff   : > { %v451_v9 = vadd.f32 %v450_v19, %v449_v8 }
 0x501   : > { %v452_v10 = vrot.slane %v451_v9, 2 }
 0x503   : > { %v453_v11 = vadd.f32 %v452_v10, %v451_v9 }
 0x505   : > { %v454_v20 = vrot.slane %v453_v11, 1 }
 0x507   : > { %v455_v63 = vadd.f32 %v454_v20, %v453_v11 }
 0x509   : > { %1274 = vpush %v455_v63 }
 0x524   : > { %v1048_v12 = vpop.permute.xlu1 %1047 }
 0x525   : > { %v1051_v13 = vsel %vm1050_vm14, %v1048_v12, 0.0 }
 0x526   : > { %1052 = vadd.xlane.f32.xlu0 %v1051_v13 }
 0x53a   : > { %s1908_s11 = spop %1274 }
 0x546   : > { %v528_v22 = vpop.xlane.xlu0 %527 }
 0x547   : > { %v529_v21 = vrot.slane %v528_v22, 4 }
 0x549   : > { %v530_v25 = vadd.f32 %v529_v21, %v528_v22 }
 0x54b   : > { %v582_v15 = vpop.xlane.xlu0 %581  ;;  %v531_v29 = vrot.slane %v530_v25, 2 }
 0x54c   : > { %v583_v23 = vrot.slane %v582_v15, 4 }
 0x54d   : > { %v532_v34 = vadd.f32 %v531_v29, %v530_v25 }
 0x54e   : > { %v584_v26 = vadd.f32 %v583_v23, %v582_v15 }
 0x54f   : > { %v768_v16 = vpop.xlane.xlu0 %767  ;;  %v533_v43 = vrot.slane %v532_v34, 1 }
 0x550   : > { %v769_v28 = vrot.slane %v768_v16, 4  ;;  %v585_v30 = vrot.slane %v584_v26, 2 }
 0x551   : > { %v534_v52 = vadd.f32 %v533_v43, %v532_v34 }
 0x552   : > { %v770_v27 = vadd.f32 %v769_v28, %v768_v16  ;;  %v586_v36 = vadd.f32 %v585_v30, %v584_v26 }
 0x553   : > { %v819_v24 = vpop.xlane.xlu0 %818 }
 0x554   : > { %v820_v31 = vrot.slane %v819_v24, 4  ;;  %v771_v37 = vrot.slane %v770_v27, 2  ;;  %v587_v48 = vrot.slane %v586_v36, 1 }
 0x556   : > { %v821_v38 = vadd.f32 %v820_v31, %v819_v24  ;;  %v772_v0 = vadd.f32 %v771_v37, %v770_v27  ;;  %v588_v58 = vadd.f32 %v587_v48, %v586_v36 }
 0x557   : > { %v1002_v17 = vpop.xlane.xlu0 %1001 }
 0x558   : > { %v1003_v39 = vrot.slane %v1002_v17, 4  ;;  %v822_v47 = vrot.slane %v821_v38, 2  ;;  %v773_v60 = vrot.slane %v772_v0, 1 }
 0x55a   : > { %v1004_v45 = vadd.f32 %v1003_v39, %v1002_v17  ;;  %v823_v61 = vadd.f32 %v822_v47, %v821_v38  ;;  %v774_v5 = vadd.f32 %v773_v60, %v772_v0  ;;  %v1079_v38 = vlaneseq }
 0x55c   : > { %v1005_v42 = vrot.slane %v1004_v45, 2  ;;  %v824_v6 = vrot.slane %v823_v61, 1  ;;  %v1080_v39 = vand.u32 127, %v1079_v38 }
 0x55e   : > { %v1006_v7 = vadd.f32 %v1005_v42, %v1004_v45  ;;  %v825_v63 = vadd.f32 %v824_v6, %v823_v61  ;;  %vm1084_vm0 = vcmp.eq.s32.totalorder %v1080_v39, 0  ;;  %vm1088_vm1 = vcmp.eq.s32.totalorder %v1080_v39, 1 }
 0x55f   : > { %vm1093_vm4 = vcmp.eq.s32.totalorder %v1080_v39, 2  ;;  %vm1098_vm6 = vcmp.eq.s32.totalorder %v1080_v39, 3 }
 0x560   : > { %v1007_v12 = vrot.slane %v1006_v7, 1 }
 0x562   : > { %v1008_v21 = vadd.f32 %v1007_v12, %v1006_v7 }
 0x563   : > { %v497_v32 = vpop.xlane.xlu1 %496 }
 0x564   : > { %v498_v33 = vrot.slane %v497_v32, 4 }
 0x566   : > { %v499_v35 = vadd.f32 %v498_v33, %v497_v32 }
 0x567   : > { %v598_v56 = vpop.xlane.xlu1 %597 }
 0x568   : > { %v500_v57 = vrot.slane %v499_v35, 2  ;;  %v599_v40 = vrot.slane %v598_v56, 4 }
 0x56a   : > { %v600_v44 = vadd.f32 %v599_v40, %v598_v56  ;;  %v501_v46 = vadd.f32 %v500_v57, %v499_v35  ;;  %v1082_v56 = vshrl.u32 %v1079_v38, 7  ;;  %v1086_v57 = vstv %s1908_s11 }
 0x56b   : > { %v788_v49 = vpop.xlane.xlu1 %787 }
 0x56c   : > { %v601_v4 = vrot.slane %v600_v44, 2  ;;  %v789_v50 = vrot.slane %v788_v49, 4  ;;  %v502_v51 = vrot.slane %v501_v46, 1  ;;  %vm1083_vm15 = vcmp.eq.s32.totalorder %v1082_v56, 0 }
 0x56d   : > { %vm1085_vm2 = vmand %vm1083_vm15, %vm1084_vm0 }
 0x56e   : > { %v790_v53 = vadd.f32 %v789_v50, %v788_v49  ;;  %v503_v55 = vadd.f32 %v502_v51, %v501_v46  ;;  %v602_v41 = vadd.f32 %v601_v4, %v600_v44  ;;  %vm1089_vm3 = vmand %vm1083_vm15, %vm1088_vm1  ;;  %v1087_v43 = vsel %vm1085_vm2, %v1086_v57, 0.0 }
 0x56f   : > { %v832_v59 = vpop.xlane.xlu1 %831  ;;  %vm1094_vm5 = vmand %vm1083_vm15, %vm1093_vm4 }
 0x570   : > { %v791_v62 = vrot.slane %v790_v53, 2  ;;  %v833_v1 = vrot.slane %v832_v59, 4  ;;  %1276 = vpush %v503_v55  ;;  %v603_v2 = vrot.slane %v602_v41, 1  ;;  %vm1099_vm7 = vmand %vm1083_vm15, %vm1098_vm6 }
 0x571   : > { %1278 = vpush %v534_v52 }
 0x572   : > { %v834_v3 = vadd.f32 %v833_v1, %v832_v59  ;;  %1280 = vpush %v588_v58  ;;  %v604_v14 = vadd.f32 %v603_v2, %v602_v41  ;;  %v792_v18 = vadd.f32 %v791_v62, %v790_v53 }
 0x573   : > { %v1022_v54 = vpop.xlane.xlu1 %1021 }
 0x574   : > { %v835_v8 = vrot.slane %v834_v3, 2  ;;  %v1023_v19 = vrot.slane %v1022_v54, 4  ;;  %1282 = vpush %v604_v14  ;;  %v793_v9 = vrot.slane %v792_v18, 1 }
 0x575   : > { %1284 = vpush %v774_v5 }
 0x576   : > { %v1024_v10 = vadd.f32 %v1023_v19, %v1022_v54  ;;  %v794_v11 = vadd.f32 %v793_v9, %v792_v18  ;;  %v836_v20 = vadd.f32 %v835_v8, %v834_v3 }
 0x577   : > { %v1066_v26 = vpop.xlane.xlu1 %1065 }
 0x578   : > { %v1025_v13 = vrot.slane %v1024_v10, 2  ;;  %1286 = vpush %v794_v11  ;;  %v837_v22 = vrot.slane %v836_v20, 1  ;;  %v1067_v24 = vrot.slane %v1066_v26, 4 }
 0x579   : > { %1288 = vpush %v825_v63 }
 0x57a   : > { %v838_v15 = vadd.f32 %v837_v22, %v836_v20  ;;  %v1026_v16 = vadd.f32 %v1025_v13, %v1024_v10  ;;  %v1068_v28 = vadd.f32 %v1067_v24, %v1066_v26 }
 0x57c   : > { %1290 = vpush %v838_v15  ;;  %v1027_v23 = vrot.slane %v1026_v16, 1  ;;  %v1069_v29 = vrot.slane %v1068_v28, 2 }
 0x57d   : > { %1292 = vpush %v1008_v21 }
 0x57e   : > { %v1028_v25 = vadd.f32 %v1027_v23, %v1026_v16  ;;  %v1070_v32 = vadd.f32 %v1069_v29, %v1068_v28 }
 0x580   : > { %1294 = vpush %v1028_v25  ;;  %v1071_v34 = vrot.slane %v1070_v32, 1 }
 0x582   : > { %v1072_v37 = vadd.f32 %v1071_v34, %v1070_v32 }
 0x5a1   : > { %s1277_s18 = spop %1276 }
 0x5a2   : > { %s1279_s17 = spop %1278 }
 0x5a3   : > { %s1281_s25 = spop %1280  ;;  %s606_s27 = sadd.f32 %s1279_s17, %s1277_s18 }
 0x5a5   : > { %s1283_s14 = spop %1282  ;;  %s607_s0 = sadd.f32 %s1281_s25, %s606_s27 }
 0x5a6   : > { %s1285_s24 = spop %1284  ;;  %s1223_s27 = sshll.u32 %s1710_s29, 3 }
 0x5a7   : > { %s608_s20 = smul.f32 2.0, %s607_s0 }
 0x5a9   : > { %s1287_s16 = spop %1286  ;;  %s609_s19 = sadd.f32 %s1283_s14, %s608_s20 }
 0x5aa   : > { %s840_s15 = sadd.f32 %s1287_s16, %s1285_s24  ;;  %s1289_s23 = spop %1288 }
 0x5ab   : > { %v1090_v40 = vstv %s609_s19  ;;  %s1105_s19 = scalar_lea.sflag [#allocation4], %s1710_s29 }
 0x5ac   : > { %s841_s26 = sadd.f32 %s1289_s23, %s840_s15  ;;  %v1091_v44 = vsel %vm1089_vm3, %v1090_v40, 0.0 }
 0x5ad   : > { %s1291_s1 = spop %1290  ;;  %v1092_v48 = vadd.f32 %v1091_v44, %v1087_v43 }
 0x5ae   : > { %s842_s28 = smul.f32 2.0, %s841_s26  ;;  %s1293_s2 = spop %1292 }
 0x5b0   : > { %s843_s17 = sadd.f32 %s1291_s1, %s842_s28  ;;  %s1229_s1 = sshll.u32 %s1571_s13, 7 }
 0x5b1   : > { %s1295_s18 = spop %1294  ;;  %s1920_s26 = scalar_lea.hbm %s1973_s9, %s1229_s1 }
 0x5b2   : > { %s1074_s25 = sadd.f32 %s1295_s18, %s1293_s2  ;;  %v1095_v46 = vstv %s843_s17  ;;  %s390_s2 = scalar_lea.vmem [#allocation7], %s1223_s27 }
 0x5b3   : > { %v1053_v30 = vpop.xlane.xlu0 %1052  ;;  %v1096_v47 = vsel %vm1094_vm5, %v1095_v46, 0.0  ;;  %s1118_s15 = sshll.u32 %s390_s2, 4  ;;  %s1499_s13 = smov [#allocation7]   ;;  %s1922_s15 = int_to_ptr.vmem [resolvable:$true] %s1118_s15 }
 0x5b4   : > { %v1054_v27 = vrot.slane %v1053_v30, 4  ;;  %v1097_v45 = vadd.f32 %v1096_v47, %v1092_v48  ;;  %s1418_s28 = scalar_lea.vmem %s1922_s15, 128  ;;  %s1422_s18 = sshll.u32 %s1499_s13, 4  ;;  %s1423_s18 = int_to_ptr.vmem [resolvable:$false] %s1422_s18 }
 0x5b5   : > { %p1419_p13 = scmp.ne.s32.totalorder %s1922_s15, %s1418_s28  ;;  %s1424_s17 = scalar_lea.vmem %s1423_s18, 256 }
 0x5b6   : > { %v1055_v31 = vadd.f32 %v1054_v27, %v1053_v30  ;;  %p1425_p5 = scmp.lt.s32.totalorder %s1922_s15, %s1423_s18  ;;  %p1426_p7 = scmp.lt.s32.totalorder %s1424_s17, %s1418_s28 }
 0x5b7   : > { %p1420_p12 = pnand %p1419_p13, %p2002_p1 }
 0x5b8   : > { %v1056_v17 = vrot.slane %v1055_v31, 2  ;;  %p1427_p9 = por %p1426_p7, %p1425_p5 }
 0x5b9   : > { %p1421_p10 = pneg %p1420_p12 }
 0x5ba   : > { %v1057_v33 = vadd.f32 %v1056_v17, %v1055_v31 }
 0x5bb   : > { %p1428_p11 = pnand %p1427_p9, %p1421_p10 }
 0x5bc   : > { %v1058_v35 = vrot.slane %v1057_v33, 1 }
 0x5be   : > { %v1059_v36 = vadd.f32 %v1058_v35, %v1057_v33 }
 0x5c0   : > { %1296 = vpush %v1059_v36 }
 0x5c1   : > { %1298 = vpush %v1072_v37 }
 0x5f1   : > { %s1297_s14 = spop %1296 }
 0x5f2   : > { %s1075_s24 = sadd.f32 %s1297_s14, %s1074_s25  ;;  %s1299_s11 = spop %1298 }
 0x5f4   : > { %s1076_s16 = smul.f32 2.0, %s1075_s24 }
 0x5f6   : > { %s1077_s0 = sadd.f32 %s1299_s11, %s1076_s16 }
 0x5f8   : > { %v1100_v49 = vstv %s1077_s0 }
 0x5f9   : > { %v1101_v0 = vsel %vm1099_vm7, %v1100_v49, 0.0 }
 0x5fa   : > { %v1102_v4 = vadd.f32 %v1101_v0, %v1097_v45 }
 0x5fc   : > { %1103 = vst [vmem:[%s390_s2] sm:$0xff] %v1102_v4 }
 0x5fd   : > { %1431 = shalt.err (!%p1428_p11)
}
 0x5fe   : > { %s1432_s29 = scalar_lea.hbm %s1920_s26, 128  ;;  %s1436_s27 = scalar_lea.hbm %s1973_s9, 256 }
 0x5ff   : > { %p1433_p3 = scmp.ne.s32.totalorder %s1920_s26, %s1432_s29  ;;  %p1437_p2 = scmp.lt.u32.totalorder %s1920_s26, %s1973_s9 }
 0x600   : > { %p1438_p4 = scmp.lt.u32.totalorder %s1436_s27, %s1432_s29  ;;  %p1440_p13 = scmp.lt.u32.totalorder %s1432_s29, %s1920_s26 }
 0x601   : > { %p1434_p8 = pnand %p1433_p3, %p2002_p1 }
 0x602   : > { %p1439_p6 = por %p1438_p4, %p1437_p2 }
 0x603   : > { %p1435_p0 = pneg %p1434_p8 }
 0x604   : > { %p1441_p12 = por %p1440_p13, %p1439_p6 }
 0x606   : > { %p1442_p10 = pnand %p1441_p12, %p1435_p0 }
 0x608   : > { %1445 = shalt.err (!%p1442_p10)
}
 0x609   : > { %1304 = dma.vmem_to_hbm [thread:$0]  (%p2002_p1), %s1922_s15, 128, %s1920_s26, %s1105_s19  }
 0x60a PF: > { %s1130_s11 = sand.u32 1, %s1476_s30   ;;  %p2003_p5 = scmp.ne.s32.totalorder %s1991_s22, 0 }
 0x60b   : > { %p2004_p7 = scmp.ge.s32.totalorder %s1488_s12, 2  ;;  %s1131_s0 = scalar_lea.sflag [#allocation4], %s1130_s11 }
 0x60d   : > { %p1314_p9 = pnand %p2004_p7, %p2003_p5 }
 0x60f   : > { %1471 = dma.done.wait (!%p1314_p9), %s1131_s0, 128  }
 0x610   : > { %1473 = vsyncadd (!%p1314_p9), %s1131_s0, 4294967168  ;;  %s2005_s12 = sld [smem:[#allocation12_spill]]  ;;  %s2006_s1 = sld [smem:[#allocation11_spill]] }
 0x611   : > { %s2007_s11 = sld [smem:[#allocation13_spill]]  ;;  %s2008_s30 = smov %s1480_s10 }
 0x616   : > { %p25_p11 = scmp.ge.s32.totalorder %s2005_s12, 4   ;;  %s2009_s10 = smov %s2006_s1 }
 0x618   :  { %27 = sbr.rel (!%p25_p11) target bundleno = 11 (0xb), region = 114 }
 0x61f   :  { %1136 = vsyncpa [#allocation3], 1 }
 0x620   :  { %1138 = vsyncpa [#allocation3 + $0x1], 1 }
 0x621   :  { %1139 = vsyncpa [#allocation6], 1 }
 0x622   :  { %1141 = vsyncpa [#allocation6 + $0x1], 1 }
 0x623   :  { %1142 = vsyncpa [#allocation4], 1 }
 0x624   :  { %1144 = vsyncpa [#allocation4 + $0x1], 1 }

</bundles_post_ra>
